<compile_context>
chip_gen: v7x
topology: tpu7x:2x2x1
jax: 0.10.0
libtpu: 0.0.40
codegen_flags: <defaults>
</compile_context>

<pallas_src>
import math

import jax
import jax.numpy as jnp
from jax import lax
from jax.experimental import pallas as pl
from jax.experimental.pallas import tpu as pltpu


def _round_up(x: int, m: int) -> int:
    return ((x + m - 1) // m) * m


# --------------------------------------------------------------------------
# Pallas kernels: one (tm, tn) output tile of  out = x @ wt + bias
# --------------------------------------------------------------------------
def _linear_kernel_f32acc(x_ref, wt_ref, b_ref, o_ref):
    """f32 output: fold bias into the k==0 init and accumulate directly into
    the resident output block (no VMEM scratch)."""
    k = pl.program_id(2)

    @pl.when(k == 0)
    def _init():
        o_ref[...] = jnp.broadcast_to(b_ref[...], o_ref.shape)

    o_ref[...] += jnp.dot(
        x_ref[...], wt_ref[...], preferred_element_type=jnp.float32
    )


def _linear_kernel_scratch(x_ref, wt_ref, b_ref, o_ref, acc_ref):
    """Non-f32 output (e.g. bf16 activations): f32 VMEM accumulator, cast on
    the final reduction step."""
    k = pl.program_id(2)

    @pl.when(k == 0)
    def _init():
        acc_ref[...] = jnp.broadcast_to(b_ref[...], acc_ref.shape)

    acc_ref[...] += jnp.dot(
        x_ref[...], wt_ref[...], preferred_element_type=jnp.float32
    )

    @pl.when(k == pl.num_programs(2) - 1)
    def _finalize():
        o_ref[...] = acc_ref[...].astype(o_ref.dtype)


# --------------------------------------------------------------------------
# Tile selection (regime-aware) and the pallas_call wrapper
# --------------------------------------------------------------------------
def _select_tiles(M: int, K: int, N: int, sublane: int = 8):
    """Pick (tm, tk, tn): lane-dense (multiples of 128 on the lane axis),
    sublane-aligned on M, sized per M-regime, VMEM-safe on every generation."""
    if M <= 64:
        # Small-M / decode regime: HBM-bound on weight streaming -> big weight
        # tiles (>= 4 MiB per grid step) to amortize per-step overhead.
        tm = _round_up(max(M, 1), sublane)
        tk_cap, tn_cap = 2048, 1024
    else:
        # Large-M: raise arithmetic intensity; double-buffered working set is
        # ~16-26 MiB, comfortably inside v7x's 64 MiB per-TC VMEM.
        tm = min(512, _round_up(M, sublane))
        tk_cap, tn_cap = 1024, 1024
    tk = min(tk_cap, _round_up(K, 128))
    tn = min(tn_cap, _round_up(N, 128))
    # v7x has 2 TensorCores per chip: guarantee >= 2 tiles along a "parallel"
    # axis when the problem is big enough to benefit.
    if pl.cdiv(M, tm) * pl.cdiv(N, tn) == 1:
        if N >= 512:
            tn = _round_up(pl.cdiv(N, 2), 128)
        elif M >= 512:
            tm = _round_up(pl.cdiv(M, 2), sublane)
    return tm, tk, tn


def _pallas_linear(x_p, wt_p, b_row, *, tm, tk, tn, out_dtype):
    """out = x_p @ wt_p + b_row.

    x_p:  (M, Kp)  activations, K zero-padded to a multiple of tk.
    wt_p: (Kp, N)  transposed effective weight (lane axis = out_features).
    b_row:(1, N)   f32 bias row.
    M/N edge blocks are partial and masked by Pallas; only K was padded.
    """
    M, Kp = x_p.shape
    Kp2, N = wt_p.shape
    assert Kp == Kp2 and Kp % tk == 0

    grid = (pl.cdiv(M, tm), pl.cdiv(N, tn), Kp // tk)

    itemsize = jnp.dtype(x_p.dtype).itemsize
    # double-buffered input tiles + resident output block + f32 accumulator
    working_set = 2 * (tm * tk + tk * tn + tn) * itemsize + 3 * tm * tn * 4
    # Cap at 48 MiB so a config tuned for v5e/v6e (128 MiB) still leaves
    # pipelining headroom on v7x (64 MiB per TC).
    vmem_limit = int(min(max(int(working_set * 1.25), 32 << 20), 48 << 20))

    use_direct = jnp.dtype(out_dtype) == jnp.dtype(jnp.float32)
    kernel = _linear_kernel_f32acc if use_direct else _linear_kernel_scratch
    scratch = [] if use_direct else [pltpu.VMEM((tm, tn), jnp.float32)]

    return pl.pallas_call(
        kernel,
        out_shape=jax.ShapeDtypeStruct((M, N), out_dtype),
        grid_spec=pltpu.PrefetchScalarGridSpec(
            num_scalar_prefetch=0,
            grid=grid,
            in_specs=[
                pl.BlockSpec((tm, tk), lambda i, j, k: (i, k)),   # activations
                # NOTE: if profiling shows exposed DMA in the small-M regime,
                # sweep pipeline_mode=pl.Buffered(3) on this weight spec.
                pl.BlockSpec((tk, tn), lambda i, j, k: (k, j)),   # weight (K, N)
                pl.BlockSpec((1, tn), lambda i, j, k: (0, j)),    # bias row
            ],
            out_specs=pl.BlockSpec((tm, tn), lambda i, j, k: (i, j)),
            scratch_shapes=scratch,
        ),
        compiler_params=pltpu.CompilerParams(
            dimension_semantics=("parallel", "parallel", "arbitrary"),
            vmem_limit_bytes=vmem_limit,
        ),
    )(x_p, wt_p, b_row)


# --------------------------------------------------------------------------
# Weight prep (fused scatter -> transpose -> K-pad) and the SparseTF forward
# --------------------------------------------------------------------------
def build_dense_weight_t(weight, nonzero_ind, k_pad=None):
    """Build the transposed effective weight directly:  wt = tt.T, K-padded.

    PyTorch:  tt[nonzero_ind[i, j], j] = weight[i, j]
    Here:     wt[j, nonzero_ind[i, j]] = weight[i, j]   with wt zero-init (Kp, N)

    Writing straight into the padded, transposed buffer removes the separate
    XLA transpose and pad copies. Duplicate target indices have an unspecified
    winner in both torch.scatter and jnp's .at[].set.
    """
    # TODO(synk): this arbitrary data-dependent scatter has no clean Pallas/TPU
    # lowering; it stays an XLA scatter and should be cached outside the
    # forward whenever weight & nonzero_ind are static (e.g. inference).
    out_f, in_f = weight.shape
    Kp = in_f if k_pad is None else k_pad
    cols = jnp.broadcast_to(
        jnp.arange(in_f, dtype=jnp.int32)[None, :], weight.shape
    )
    wt = jnp.zeros((Kp, out_f), dtype=weight.dtype)
    return wt.at[cols, nonzero_ind.astype(jnp.int32)].set(weight)


def sparse_tf_forward(x, weight, bias, nonzero_ind, *, compute_dtype=None):
    """out = x @ tt.T + bias, tt = scatter(zeros_like(weight), nonzero_ind, weight).

    compute_dtype=jnp.bfloat16 casts activations & weight to bf16 (f32 MXU
    accumulation) for native MXU rate / half the HBM traffic; default keeps the
    module's dtype.
    """
    out_f, in_f = weight.shape
    lead = x.shape[:-1]
    x2d = x.reshape(-1, in_f)
    M, K, N = x2d.shape[0], in_f, out_f

    out_dtype = x.dtype
    cdt = jnp.dtype(compute_dtype) if compute_dtype is not None else jnp.dtype(x.dtype)
    sublane = 16 if cdt == jnp.dtype(jnp.bfloat16) else 8

    tm, tk, tn = _select_tiles(M, K, N, sublane)
    Kp = _round_up(K, tk)

    # Fused scatter -> transpose -> K-pad of the weight.
    wt_p = build_dense_weight_t(weight.astype(cdt), nonzero_ind, Kp)   # (Kp, N)

    # Zero-pad ONLY the reduction axis of the activations (required so padding
    # never pollutes the accumulator); M/N edge blocks are masked by Pallas.
    x_p = x2d.astype(cdt)
    if Kp != K:
        x_p = jnp.pad(x_p, ((0, 0), (0, Kp - K)))

    if bias is None:
        b_row = jnp.zeros((1, N), dtype=jnp.float32)
    else:
        b_row = bias.astype(jnp.float32).reshape(1, N)

    out = _pallas_linear(x_p, wt_p, b_row, tm=tm, tk=tk, tn=tn, out_dtype=out_dtype)
    return out.reshape(*lead, N)


# --------------------------------------------------------------------------
# Parameter init mirroring the PyTorch module
# --------------------------------------------------------------------------
def init_params(key, in_features, out_features, dtype=jnp.float32):
    wkey, bkey = jax.random.split(key)
    # kaiming_uniform_(a=sqrt(5)) on (out, in)  ->  bound = 1/sqrt(fan_in)
    bound = 1.0 / math.sqrt(in_features)
    weight = jax.random.uniform(
        wkey, (out_features, in_features), dtype=dtype, minval=-bound, maxval=bound
    )
    bias = jax.random.uniform(
        bkey, (out_features,), dtype=dtype, minval=-bound, maxval=bound
    )
    return weight, bias


if __name__ == "__main__":
    key = jax.random.PRNGKey(0)
    in_features, out_features, batch = 32, 8, 16

    pkey, mkey, xkey = jax.random.split(key, 3)
    weight, bias = init_params(pkey, in_features, out_features)

    # `mask` plays the role of the pandas DataFrame in the torch module:
    # shape (in_features, out_features); nonzero_ind = (mask != 0).T as int.
    # Like the torch module this yields 0/1 indices (duplicates per column);
    # duplicate-resolution order is unspecified in both frameworks, so the
    # reference below uses the SAME densified weight the forward uses.
    mask = jax.random.uniform(mkey, (in_features, out_features)) > 0.5
    nonzero_ind = mask.T.astype(jnp.int32)  # (out_features, in_features)

    x = jax.random.normal(xkey, (batch, in_features), dtype=jnp.float32)

    out = sparse_tf_forward(x, weight, bias, nonzero_ind)
    out = jax.block_until_ready(out)

    # Pure-JAX reference (same fused densified weight, full-precision matmul).
    tm, tk, tn = _select_tiles(batch, in_features, out_features)
    Kp = _round_up(in_features, tk)
    wt_p = build_dense_weight_t(weight, nonzero_ind, Kp)
    ref = (
        jnp.dot(x, wt_p[:in_features, :], precision=lax.Precision.HIGHEST)
        + bias[None, :]
    )

    assert out.shape == (batch, out_features)
    assert jnp.allclose(out, ref, atol=1e-4, rtol=1e-4), "mismatch vs reference"

    print("KERNEL_OK")
</pallas_src>

<mosaic_0001>
module attributes {stable_mosaic.version = 11 : i64} {
  func.func @_linear_kernel_f32acc(%arg0: i32, %arg1: i32, %arg2: i32, %arg3: memref<16x128xf32, #tpu.memory_space<vmem>>, %arg4: memref<128x128xf32, #tpu.memory_space<vmem>>, %arg5: memref<1x128xf32, #tpu.memory_space<vmem>>, %arg6: memref<16x128xf32, #tpu.memory_space<vmem>>) attributes {dimension_semantics = [#tpu.dimension_semantics<parallel>, #tpu.dimension_semantics<parallel>, #tpu.dimension_semantics<arbitrary>], iteration_bounds = array<i64: 1, 1, 1>, scalar_prefetch = 0 : i64, scratch_operands = 0 : i64, tpu.core_type = #tpu.core_type<tc>, window_params = [{transform_indices = @transform_0, window_bounds = array<i64: 16, 128>}, {transform_indices = @transform_1, window_bounds = array<i64: 128, 128>}, {transform_indices = @transform_2, window_bounds = array<i64: 1, 128>}, {transform_indices = @transform_3, window_bounds = array<i64: 16, 128>}]} {
    %c0_i32 = arith.constant 0 : i32
    %0 = arith.cmpi eq, %arg2, %c0_i32 : i32
    %1 = arith.extui %0 : i1 to i32
    %c0_i32_0 = arith.constant 0 : i32
    %2 = arith.cmpi ne, %1, %c0_i32_0 : i32
    scf.if %2 {
      %c0_8 = arith.constant 0 : index
      %c0_9 = arith.constant 0 : index
      %9 = vector.load %arg5[%c0_8, %c0_9] : memref<1x128xf32, #tpu.memory_space<vmem>>, vector<1x128xf32>
      %10 = vector.shape_cast %9 : vector<1x128xf32> to vector<1x128xf32>
      %11 = vector.broadcast %10 : vector<1x128xf32> to vector<16x128xf32>
      %c0_10 = arith.constant 0 : index
      %c0_11 = arith.constant 0 : index
      %12 = vector.load %arg6[%c0_10, %c0_11] : memref<16x128xf32, #tpu.memory_space<vmem>>, vector<16x128xf32>
      tpu.vector_store %arg6[%c0_10, %c0_11], %11 {strides = array<i32>} : memref<16x128xf32, #tpu.memory_space<vmem>>, vector<16x128xf32>,
    } else {
    }
    %c0 = arith.constant 0 : index
    %c0_1 = arith.constant 0 : index
    %3 = vector.load %arg6[%c0, %c0_1] : memref<16x128xf32, #tpu.memory_space<vmem>>, vector<16x128xf32>
    %c0_2 = arith.constant 0 : index
    %c0_3 = arith.constant 0 : index
    %4 = vector.load %arg3[%c0_2, %c0_3] : memref<16x128xf32, #tpu.memory_space<vmem>>, vector<16x128xf32>
    %c0_4 = arith.constant 0 : index
    %c0_5 = arith.constant 0 : index
    %5 = vector.load %arg4[%c0_4, %c0_5] : memref<128x128xf32, #tpu.memory_space<vmem>>, vector<128x128xf32>
    %cst = arith.constant dense<0.000000e+00> : vector<16x128xf32>
    %6 = tpu.matmul %4, %5, %cst {dimension_numbers = #tpu.dot_dimension_numbers<[1], [0], [0], [1], [0, 0, 1, 1], [], []>} : vector<16x128xf32>, vector<128x128xf32>, vector<16x128xf32> -> vector<16x128xf32>
    %7 = arith.addf %3, %6 : vector<16x128xf32>
    %c0_6 = arith.constant 0 : index
    %c0_7 = arith.constant 0 : index
    %8 = vector.load %arg6[%c0_6, %c0_7] : memref<16x128xf32, #tpu.memory_space<vmem>>, vector<16x128xf32>
    tpu.vector_store %arg6[%c0_6, %c0_7], %7 {strides = array<i32>} : memref<16x128xf32, #tpu.memory_space<vmem>>, vector<16x128xf32>,
    return
  }
  func.func @transform_0(%arg0: i32, %arg1: i32, %arg2: i32) -> (i32, i32) {
    %c0_i32 = arith.constant 0 : i32
    return %arg0, %arg2 : i32, i32
  }
  func.func @transform_1(%arg0: i32, %arg1: i32, %arg2: i32) -> (i32, i32) {
    %c0_i32 = arith.constant 0 : i32
    return %arg2, %arg1 : i32, i32
  }
  func.func @transform_2(%arg0: i32, %arg1: i32, %arg2: i32) -> (i32, i32) {
    %c0_i32 = arith.constant 0 : i32
    %c0_i32_0 = arith.constant 0 : i32
    return %c0_i32, %arg1 : i32, i32
  }
  func.func @transform_3(%arg0: i32, %arg1: i32, %arg2: i32) -> (i32, i32) {
    %c0_i32 = arith.constant 0 : i32
    return %arg0, %arg1 : i32, i32
  }
}

</mosaic_0001>

<bundles_post_ra>
// kernel: tpu_custom_call.1
= control target key start
LH: loop header
LB: loop body
LE: loop exit
PB: predicated region body
PF: predicated region fallthrough
CT: control target
= control target key end

     0   :  { %s299_s1 = inlined_call_operand.vmem [shape: f32[128,8], index: 1, kind: input, shape index: {}]   ;;  %s300_s0 = inlined_call_operand.vmem [shape: f32[16,128], index: 0, kind: input, shape index: {}]   ;;  %s301_s2 = inlined_call_operand.vmem [shape: f32[1,8], index: 2, kind: input, shape index: {}]   ;;  %s302_s3 = inlined_call_operand.vmem [shape: f32[16,8], index: 3, kind: output, shape index: {}]  }
   0x1   :  { %v31_v0 = vld [vmem:[%s299_s1] sm:$0xff]  ;;  %v32_v1 = vld [vmem:[%s299_s1 + $0x8] sm:$0xff]  ;;  %v33_v2 = vld [vmem:[%s299_s1 + $0x10] sm:$0xff] }
   0x2   :  { %v184_v3 = vpack.c.bf16 %v32_v1, %v31_v0  ;;  %v34_v4 = vld [vmem:[%s299_s1 + $0x18] sm:$0xff]  ;;  %v35_v6 = vld [vmem:[%s299_s1 + $0x20] sm:$0xff]  ;;  %v36_v7 = vld [vmem:[%s299_s1 + $0x28] sm:$0xff] }
   0x3   :  { %v188_v5 = vpack.c.bf16 %v34_v4, %v33_v2  ;;  %v192_v8 = vpack.c.bf16 %v36_v7, %v35_v6  ;;  %v29_v9 = vld [vmem:[%s300_s0] sm:$0xff]  ;;  %v37_v10 = vld [vmem:[%s299_s1 + $0x30] sm:$0xff]  ;;  %v38_v11 = vld [vmem:[%s299_s1 + $0x38] sm:$0xff] }
   0x4   :  { %185 = vmatprep.subr.bf16.mxu0 %v184_v3  ;;  %181 = vmatprep.mubr.f32.mxu0 %v29_v9  ;;  %v196_v12 = vpack.c.bf16 %v38_v11, %v37_v10  ;;  %v39_v13 = vld [vmem:[%s299_s1 + $0x40] sm:$0xff]  ;;  %v40_v14 = vld [vmem:[%s299_s1 + $0x48] sm:$0xff]  ;;  %v41_v16 = vld [vmem:[%s299_s1 + $0x50] sm:$0xff] }
   0x5   :  { %187 = vmatpush3.bf16.msra.mxu0 %v184_v3  ;;  %v200_v15 = vpack.c.bf16 %v40_v14, %v39_v13  ;;  %v42_v17 = vld [vmem:[%s299_s1 + $0x58] sm:$0xff]  ;;  %v43_v19 = vld [vmem:[%s299_s1 + $0x60] sm:$0xff]  ;;  %v44_v20 = vld [vmem:[%s299_s1 + $0x68] sm:$0xff] }
   0x6   :  { %189 = vmatprep.subr.bf16.mxu0 %v188_v5  ;;  %v204_v18 = vpack.c.bf16 %v42_v17, %v41_v16  ;;  %v208_v21 = vpack.c.bf16 %v44_v20, %v43_v19  ;;  %v45_v22 = vld [vmem:[%s299_s1 + $0x70] sm:$0xff]  ;;  %v46_v23 = vld [vmem:[%s299_s1 + $0x78] sm:$0xff]  ;;  %v30_v25 = vld [vmem:[%s300_s0 + $0x8] sm:$0xff] }
   0x7   :  { %v212_v24 = vpack.c.bf16 %v46_v23, %v45_v22  ;;  %v130_v26 = vld [vmem:[%s301_s2] ss:$0 sm:$0xff] }
   0x9   :  { %191 = vmatpush3.bf16.msra.mxu0 %v188_v5 }
   0xa   :  { %193 = vmatprep.subr.bf16.mxu0 %v192_v8 }
   0xd   :  { %195 = vmatpush3.bf16.msra.mxu0 %v192_v8 }
   0xe   :  { %197 = vmatprep.subr.bf16.mxu0 %v196_v12 }
  0x11   :  { %199 = vmatpush3.bf16.msra.mxu0 %v196_v12 }
  0x12   :  { %201 = vmatprep.subr.bf16.mxu0 %v200_v15 }
  0x15   :  { %203 = vmatpush3.bf16.msra.mxu0 %v200_v15 }
  0x16   :  { %205 = vmatprep.subr.bf16.mxu0 %v204_v18 }
  0x19   :  { %207 = vmatpush3.bf16.msra.mxu0 %v204_v18 }
  0x1a   :  { %209 = vmatprep.subr.bf16.mxu0 %v208_v21 }
  0x1d   :  { %211 = vmatpush3.bf16.msra.mxu0 %v208_v21 }
  0x1e   :  { %213 = vmatprep.subr.bf16.mxu0 %v212_v24 }
  0x21   :  { %215 = vmatpush3.bf16.msra.mxu0 %v212_v24 }
  0x24   :  { %182 = vmatmul.mubr.f32.vlgmr.msra.gmra.mrb[0].mxu0 %v30_v25 }
  0xf7   :  { %v183_v27 = vpop.f32.mrb[0].mxu0 }
  0xf8   :  { %v123_v28 = vadd.f32 %v183_v27, %v130_v26  ;;  %v113_v29 = vpop.f32.mrb[1].mxu0 }
  0xf9   :  { %v122_v30 = vadd.f32 %v130_v26, %v113_v29 }
  0xfa   :  { %125 = vst [vmem:[%s302_s3 + $0x8] sm:$0xff] %v123_v28 }
  0xfb   :  { %124 = vst [vmem:[%s302_s3] sm:$0xff] %v122_v30 }

</bundles_post_ra>
